<compile_context>
chip_gen: v7x
topology: tpu7x:2x2x1
jax: 0.10.0
libtpu: 0.0.40
codegen_flags: <defaults>
</compile_context>

<pallas_src>
import jax
import jax.numpy as jnp
from jax import lax
from jax.experimental import pallas as pl
from jax.experimental.pallas import tpu as pltpu

EPS = 1e-5

# Tile caps (f32): 256 x 2048 x 4B = 2 MiB per tile; input + output tiles
# double-buffered is ~8 MiB of VMEM -> fits every generation's scoped limit
# (v5e 16 MiB default, v6e 32 MiB, v7x 32 MiB) with headroom.
_TM_MAX = 256      # sublane (row) tile, multiple of 8
_TN_MAX = 2048     # lane (spatial) tile, multiple of 128


def _round_up(x, m):
    return ((x + m - 1) // m) * m


def frozen_bn_kernel(x_ref, scale_ref, bias_ref, o_ref):
    # Pure FMA: out = x * scale + bias.
    # scale/bias blocks are (TM, 1) and broadcast across the lane axis.
    o_ref[...] = x_ref[...] * scale_ref[...] + bias_ref[...]


def frozen_batch_norm_2d(x, weight, bias, running_mean, running_var):
    """x: (N, C, H, W). Returns (N, C, H, W) — matches PyTorch FrozenBatchNorm2d."""
    n, c, h, w = x.shape
    hw = h * w
    rows = n * c

    # Hoist frozen-statistics math out of the kernel (runs once, on (C,)).
    scale = weight * lax.rsqrt(running_var + EPS)        # (C,)
    fbias = bias - running_mean * scale                  # (C,)

    # Per-row params (row = n*C + c) so the flattened 2D layout lines up.
    scale_rows = jnp.broadcast_to(scale[None, :], (n, c)).reshape(rows, 1)
    fbias_rows = jnp.broadcast_to(fbias[None, :], (n, c)).reshape(rows, 1)

    x2 = x.reshape(rows, hw)

    # (8,128)-aligned, lane-dense tiles; partial edge blocks (if any) are
    # handled by Pallas boundary masking, so no wrapper-side pad/copy of x.
    tm = min(_TM_MAX, _round_up(rows, 8))
    tn = min(_TN_MAX, _round_up(hw, 128))
    grid = (pl.cdiv(rows, tm), pl.cdiv(hw, tn))

    param_spec = pl.BlockSpec((tm, 1), lambda i, j: (i, 0))

    itemsize = jnp.dtype(x.dtype).itemsize
    cost = pl.CostEstimate(
        flops=2 * rows * hw,                       # one mul + one add per element
        transcendentals=0,                         # rsqrt hoisted to wrapper
        bytes_accessed=2 * rows * hw * itemsize + 2 * rows * 4,
    )

    out = pl.pallas_call(
        frozen_bn_kernel,
        out_shape=jax.ShapeDtypeStruct((rows, hw), x.dtype),
        grid=grid,
        in_specs=[
            pl.BlockSpec((tm, tn), lambda i, j: (i, j)),
            param_spec,
            param_spec,
        ],
        out_specs=pl.BlockSpec((tm, tn), lambda i, j: (i, j)),
        compiler_params=pltpu.CompilerParams(
            dimension_semantics=("parallel", "parallel"),
            vmem_limit_bytes=32 * 1024 * 1024,
        ),
        cost_estimate=cost,
    )(x2, scale_rows, fbias_rows)

    return out.reshape(n, c, h, w)


if __name__ == "__main__":
    key = jax.random.PRNGKey(0)
    k_x, k_w, k_b, k_rm, k_rv = jax.random.split(key, 5)

    N, C, H, W = 2, 4, 16, 16

    x = jax.random.normal(k_x, (N, C, H, W), dtype=jnp.float32)

    # Deterministic "frozen" buffers (module __init__ shapes: all (C,)),
    # randomized so the affine transform is non-trivial.
    weight = 1.0 + 0.1 * jax.random.normal(k_w, (C,), dtype=jnp.float32)
    bias = 0.1 * jax.random.normal(k_b, (C,), dtype=jnp.float32)
    running_mean = 0.1 * jax.random.normal(k_rm, (C,), dtype=jnp.float32)
    running_var = jnp.abs(1.0 + 0.1 * jax.random.normal(k_rv, (C,), dtype=jnp.float32))

    out = frozen_batch_norm_2d(x, weight, bias, running_mean, running_var)
    out = jax.block_until_ready(out)

    # Pure-JAX reference (mirrors the PyTorch forward exactly).
    w_ = weight.reshape(1, -1, 1, 1)
    b_ = bias.reshape(1, -1, 1, 1)
    rv_ = running_var.reshape(1, -1, 1, 1)
    rm_ = running_mean.reshape(1, -1, 1, 1)
    scale_ref = w_ * lax.rsqrt(rv_ + EPS)
    bias_ref = b_ - rm_ * scale_ref
    ref = x * scale_ref + bias_ref

    assert out.shape == (N, C, H, W)
    assert jnp.allclose(out, ref, atol=1e-5, rtol=1e-5)

    print("KERNEL_OK")
</pallas_src>

<mosaic_0001>
module attributes {stable_mosaic.version = 11 : i64} {
  func.func @frozen_bn_kernel(%arg0: i32, %arg1: i32, %arg2: memref<8x256xf32, #tpu.memory_space<vmem>>, %arg3: memref<8x1xf32, #tpu.memory_space<vmem>>, %arg4: memref<8x1xf32, #tpu.memory_space<vmem>>, %arg5: memref<8x256xf32, #tpu.memory_space<vmem>>) attributes {dimension_semantics = [#tpu.dimension_semantics<parallel>, #tpu.dimension_semantics<parallel>], iteration_bounds = array<i64: 1, 1>, scalar_prefetch = 0 : i64, scratch_operands = 0 : i64, tpu.core_type = #tpu.core_type<tc>, window_params = [{transform_indices = @transform_0, window_bounds = array<i64: 8, 256>}, {transform_indices = @transform_1, window_bounds = array<i64: 8, 1>}, {transform_indices = @transform_2, window_bounds = array<i64: 8, 1>}, {transform_indices = @transform_3, window_bounds = array<i64: 8, 256>}]} {
    %c0 = arith.constant 0 : index
    %c0_0 = arith.constant 0 : index
    %0 = vector.load %arg2[%c0, %c0_0] : memref<8x256xf32, #tpu.memory_space<vmem>>, vector<8x256xf32>
    %c0_1 = arith.constant 0 : index
    %c0_2 = arith.constant 0 : index
    %1 = vector.load %arg3[%c0_1, %c0_2] : memref<8x1xf32, #tpu.memory_space<vmem>>, vector<8x1xf32>
    %2 = vector.broadcast %1 : vector<8x1xf32> to vector<8x256xf32>
    %3 = arith.mulf %0, %2 : vector<8x256xf32>
    %c0_3 = arith.constant 0 : index
    %c0_4 = arith.constant 0 : index
    %4 = vector.load %arg4[%c0_3, %c0_4] : memref<8x1xf32, #tpu.memory_space<vmem>>, vector<8x1xf32>
    %5 = vector.broadcast %4 : vector<8x1xf32> to vector<8x256xf32>
    %6 = arith.addf %3, %5 : vector<8x256xf32>
    %c0_5 = arith.constant 0 : index
    %c0_6 = arith.constant 0 : index
    %7 = vector.load %arg5[%c0_5, %c0_6] : memref<8x256xf32, #tpu.memory_space<vmem>>, vector<8x256xf32>
    tpu.vector_store %arg5[%c0_5, %c0_6], %6 {strides = array<i32>} : memref<8x256xf32, #tpu.memory_space<vmem>>, vector<8x256xf32>,
    return
  }
  func.func @transform_0(%arg0: i32, %arg1: i32) -> (i32, i32) {
    %c0_i32 = arith.constant 0 : i32
    return %arg0, %arg1 : i32, i32
  }
  func.func @transform_1(%arg0: i32, %arg1: i32) -> (i32, i32) {
    %c0_i32 = arith.constant 0 : i32
    %c0_i32_0 = arith.constant 0 : i32
    return %arg0, %c0_i32 : i32, i32
  }
  func.func @transform_2(%arg0: i32, %arg1: i32) -> (i32, i32) {
    %c0_i32 = arith.constant 0 : i32
    %c0_i32_0 = arith.constant 0 : i32
    return %arg0, %c0_i32 : i32, i32
  }
  func.func @transform_3(%arg0: i32, %arg1: i32) -> (i32, i32) {
    %c0_i32 = arith.constant 0 : i32
    return %arg0, %arg1 : i32, i32
  }
}

</mosaic_0001>

<bundles_post_ra>
// kernel: tpu_custom_call.1
= control target key start
LH: loop header
LB: loop body
LE: loop exit
PB: predicated region body
PF: predicated region fallthrough
CT: control target
= control target key end

     0   :  { %s122_s0 = inlined_call_operand.vmem [shape: f32[8,256], index: 0, kind: input, shape index: {}]   ;;  %s123_s1 = inlined_call_operand.vmem [shape: f32[8,1], index: 1, kind: input, shape index: {}]   ;;  %s124_s2 = inlined_call_operand.vmem [shape: f32[8,1], index: 2, kind: input, shape index: {}]   ;;  %s125_s3 = inlined_call_operand.hbm [shape: f32[8,256], index: 3, kind: output, shape index: {}]  }
   0x1   :  { %v17_v0 = vld [vmem:[%s123_s1] sm:$0xff] }
   0x2   :  { %8 = vsyncpa [#allocation3], 0  ;;  %v76_v1 = vmov 0   ;;  %v25_v2 = vld [vmem:[%s124_s2] sm:$0xff]  ;;  %v16_v5 = vld [vmem:[%s122_s0 + $0x8] sm:$0xff]  ;;  %s77_s20 = smov [#allocation2]  }
   0x3   :  { %51 = vset.pattern.permute.xlu0 %v76_v1  ;;  %v15_v4 = vld [vmem:[%s122_s0] sm:$0xff]  ;;  %s41_s1 = sshll.u32 %s77_s20, 4  ;;  %s42_s1 = int_to_ptr.vmem [resolvable:$true] %s41_s1 }
   0x4   :  { %20 = vperm.xlu0 %51, %v17_v0   ;;  %s52_s2 = scalar_lea.vmem %s42_s1, 256  ;;  %p57_p1 = scmp.lt.s32.totalorder %s42_s1, %s42_s1 }
   0x5   :  { %p53_p0 = scmp.ne.s32.totalorder %s42_s1, %s52_s2  ;;  %p58_p2 = scmp.lt.s32.totalorder %s52_s2, %s52_s2 }
   0x7   :  { %p59_p3 = por %p58_p2, %p57_p1 }
   0x8   :  { %28 = vperm.xlu0 %51, %v25_v2  }
   0x9   :  { %p60_p4 = pnand %p59_p3, %p53_p0 }
  0x83   :  { %v21_v3 = vpop.permute.xlu0 %20 }
  0x84   :  { %v23_v6 = vmul.f32 %v21_v3, %v15_v4  ;;  %v24_v7 = vmul.f32 %v21_v3, %v16_v5 }
  0x87   :  { %v29_v8 = vpop.permute.xlu0 %28 }
  0x88   :  { %v31_v9 = vadd.f32 %v29_v8, %v23_v6  ;;  %v32_v10 = vadd.f32 %v29_v8, %v24_v7 }
  0x8a   :  { %33 = vst [vmem:[#allocation2] sm:$0xff] %v31_v9  ;;  %34 = vst [vmem:[#allocation2 + $0x8] sm:$0xff] %v32_v10 }
  0x8b   :  { %63 = shalt.err (!%p60_p4)
}
  0x8c   :  { %s64_s0 = scalar_lea.hbm %s125_s3, 256 }
  0x8d   :  { %p65_p5 = scmp.ne.s32.totalorder %s125_s3, %s64_s0  ;;  %p68_p6 = scmp.lt.u32.totalorder %s64_s0, %s125_s3 }
  0x8f   :  { %p70_p7 = pnand %p68_p6, %p65_p5 }
  0x91   :  { %73 = shalt.err (!%p70_p7)
}
  0x92   :  { %44 = dma.vmem_to_hbm [thread:$0]  %s42_s1, 256, %s125_s3, [#allocation3]  }
  0x93   :  { %74 = dma.done.wait [#allocation3], 256  }
  0x94   :  { %75 = vsyncadd [#allocation3], 4294967040 }
  0x95   :  { %48 = vsyncpa [#allocation3], 1 }

</bundles_post_ra>
